<compile_context>
chip_gen: v7x
topology: tpu7x:2x2x1
jax: 0.10.0
libtpu: 0.0.40
codegen_flags: <defaults>
</compile_context>

<pallas_src>
import functools

import jax
import jax.numpy as jnp
from jax.experimental import pallas as pl
from jax.experimental.pallas import tpu as pltpu


def _round_up(x, m):
    return (x + m - 1) // m * m


def _vmem_capacity_bytes():
    try:
        return int(pltpu.get_tpu_info().vmem_capacity_bytes)
    except Exception:
        return 64 * 1024 * 1024          # conservative default (v7x per-TC physical VMEM)


def _choose_row_tile(n, c, itemsize, tile_budget_bytes):
    """Rows per tile, sized by a VMEM byte budget (no fixed row cap).

    Budget per tile-row:
      * logits, double buffered:                                2 * C * itemsize
      * targets (TN,1) int32, lane-padded to 128, double buf:   2 * 128 * 4
      * ~3 live full-tile f32 temporaries (shifted/exp/select): 3 * C * 4
    """
    per_row = 2 * c * itemsize + 2 * 128 * 4 + 3 * c * 4
    tn = tile_budget_bytes // max(1, per_row)
    tn = max(8, (tn // 8) * 8)                       # sublane multiple
    tn = min(tn, max(8, (n // 8) * 8))               # don't exceed the batch
    return tn


def _ultra_loss_kernel(logits_ref, targets_ref, out_ref, *,
                       gamma, label_smoothing, n_valid, tile_rows, needs_mask):
    xin = logits_ref[...]                                   # (TN, C), input dtype
    tn, c = xin.shape

    # Row max in the input dtype (max is exact in bf16); fold the f32 upcast into
    # the subtraction so only one full-tile f32 chain stays live.
    m = jnp.max(xin, axis=1, keepdims=True)
    shifted = xin.astype(jnp.float32) - m.astype(jnp.float32)            # (TN, C)

    # Pieces of a numerically stable log-softmax; log_probs never materialized.
    lse = jnp.log(jnp.sum(jnp.exp(shifted), axis=1, keepdims=True))      # (TN, 1)
    s_sum = jnp.sum(shifted, axis=1, keepdims=True)                      # (TN, 1)

    # Target logit via iota-compare (no gather / one-hot matmul needed).
    t = targets_ref[...]                                                 # (TN, 1) i32
    col = jax.lax.broadcasted_iota(jnp.int32, (tn, c), 1)
    t_logit = jnp.sum(jnp.where(col == t, shifted, 0.0), axis=1, keepdims=True)
    # TODO(synk): on v7x these lane reductions could be offloaded to the idle MXU
    # (jnp.dot against a ones column at precision=HIGHEST); kept on VPU/XLU here so
    # lse/ce stay exact on every chip generation.

    ce = lse - t_logit                               # per-row cross entropy (TN, 1)

    # ---- focal term (alpha=None branch of the module) ----
    pt = jnp.exp(-ce)
    one_minus_pt = jnp.maximum(1.0 - pt, 0.0)        # clamp: pt can round above 1
    if float(gamma) == int(gamma) and int(gamma) >= 0:
        w = jnp.ones_like(one_minus_pt)              # integer gamma -> VALU multiplies
        for _ in range(int(gamma)):
            w = w * one_minus_pt
    else:
        w = jnp.power(one_minus_pt, gamma)           # generic float gamma (EUP path)
    focal_row = w * ce
    # TODO(synk): per-class alpha weighting (module's optional alpha tensor) is not
    # implemented; the module default alpha=None matches this branch.

    # ---- label-smoothed cross entropy, algebraically folded ----
    smooth_row = ((1.0 - label_smoothing) * ce
                  + label_smoothing * lse
                  - (label_smoothing / c) * s_sum)

    loss_row = 0.7 * focal_row + 0.3 * smooth_row

    if needs_mask:
        row = (pl.program_id(0) * tile_rows
               + jax.lax.broadcasted_iota(jnp.int32, (tn, 1), 0))
        # where (not a multiply): out-of-bounds rows may hold NaN/Inf garbage.
        loss_row = jnp.where(row < n_valid, loss_row, 0.0)

    tile_sum = jnp.sum(loss_row)

    # Single (8,128)-padded, lane-dense per-tile partial; wrapper reads [:, 0, 0].
    out_ref[...] = jnp.broadcast_to(tile_sum, out_ref.shape).astype(jnp.float32)


def ultra_loss(logits, targets, *, gamma=2.0, label_smoothing=0.05):
    """logits: (N, C) float (f32 or bf16), targets: (N,) int. Returns scalar f32 loss.

    Feeding bf16 logits halves HBM traffic (the kernel upcasts per-tile); all math
    is done in f32 inside the kernel (v5e's VPU/EUP lack bf16 anyway).
    """
    n, c = logits.shape
    itemsize = jnp.dtype(logits.dtype).itemsize

    # VMEM-generation-aware budget: v5e/v6e (128 MiB physical) -> 96 MiB scoped,
    # v7x (64 MiB physical) -> 48 MiB scoped; tiles use ~60% of that, the rest is
    # headroom for Mosaic scratch / relayouts.
    vmem_limit = min(96 * 1024 * 1024, (_vmem_capacity_bytes() * 3) // 4)
    tile_budget = (vmem_limit * 3) // 5
    tn = _choose_row_tile(n, c, itemsize, tile_budget)
    g = pl.cdiv(n, tn)

    targets2d = targets.astype(jnp.int32).reshape(n, 1)

    kernel = functools.partial(
        _ultra_loss_kernel,
        gamma=float(gamma),
        label_smoothing=float(label_smoothing),
        n_valid=n,
        tile_rows=tn,
        needs_mask=(n % tn) != 0,
    )

    cost = pl.CostEstimate(
        flops=10 * n * c,
        transcendentals=n * c + 2 * n,
        bytes_accessed=n * c * itemsize + n * 4 + g * 8 * 128 * 4,
    )

    partials = pl.pallas_call(
        kernel,
        out_shape=jax.ShapeDtypeStruct((g, 8, 128), jnp.float32),
        grid=(g,),
        in_specs=[
            # Logits tile in the input dtype (bf16 stays bf16 over HBM).
            pl.BlockSpec((tn, c), lambda i: (i, 0)),
            # (TN, 1) int32 targets tile; its 128-lane VMEM padding is included in
            # the tile-size budget above (HBM traffic for it is only 4 B/row).
            pl.BlockSpec((tn, 1), lambda i: (i, 0)),
        ],
        out_specs=pl.BlockSpec((1, 8, 128), lambda i: (i, 0, 0)),
        compiler_params=pltpu.CompilerParams(
            # No carried accumulator -> embarrassingly parallel grid axis.
            # TODO(synk): verify via xprof that this shards across v7x's two
            # TensorCores; if only one TC is busy, switch to pltpu.CORE_PARALLEL.
            dimension_semantics=("parallel",),
            vmem_limit_bytes=vmem_limit,
        ),
        cost_estimate=cost,
    )(logits, targets2d)

    return jnp.sum(partials[:, 0, 0]) * (1.0 / float(n))


def _reference(logits, targets, gamma=2.0, label_smoothing=0.05):
    # Pure-JAX reference of the PyTorch forward for sanity.
    logits = logits.astype(jnp.float32)
    log_probs = jax.nn.log_softmax(logits, axis=1)
    onehot = jax.nn.one_hot(targets, logits.shape[1], dtype=jnp.float32)
    ce = -jnp.sum(onehot * log_probs, axis=1)
    pt = jnp.exp(-ce)
    focal = jnp.mean((1.0 - pt) ** gamma * ce)
    smooth = onehot * (1.0 - label_smoothing) + label_smoothing / logits.shape[1]
    smooth_ce = jnp.mean(-jnp.sum(smooth * log_probs, axis=1))
    return 0.7 * focal + 0.3 * smooth_ce


if __name__ == "__main__":
    key = jax.random.PRNGKey(0)
    k1, k2, k3, k4, k5, k6 = jax.random.split(key, 6)

    # Primary small case: batch of 8 samples, 32 classes (single full tile).
    N, C = 8, 32
    logits = jax.random.normal(k1, (N, C), dtype=jnp.float32)
    targets = jax.random.randint(k2, (N,), 0, C, dtype=jnp.int32)
    loss = jax.block_until_ready(ultra_loss(logits, targets))
    ref = _reference(logits, targets)
    assert jnp.allclose(loss, ref, rtol=1e-5, atol=1e-5), (loss, ref)

    # Ragged batch: N % TN != 0 exercises the in-kernel where-mask (no wrapper pad).
    N2, C2 = 10, 32
    logits2 = jax.random.normal(k3, (N2, C2), dtype=jnp.float32)
    targets2 = jax.random.randint(k4, (N2,), 0, C2, dtype=jnp.int32)
    loss2 = jax.block_until_ready(ultra_loss(logits2, targets2))
    ref2 = _reference(logits2, targets2)
    assert jnp.allclose(loss2, ref2, rtol=1e-5, atol=1e-5), (loss2, ref2)

    # bf16 logits (recommended on v5e/v6e: halves HBM traffic; in-kernel math is f32).
    N3, C3 = 24, 48
    logits3 = jax.random.normal(k5, (N3, C3), dtype=jnp.float32).astype(jnp.bfloat16)
    targets3 = jax.random.randint(k6, (N3,), 0, C3, dtype=jnp.int32)
    loss3 = jax.block_until_ready(ultra_loss(logits3, targets3))
    ref3 = _reference(logits3.astype(jnp.float32), targets3)
    assert jnp.allclose(loss3, ref3, rtol=1e-4, atol=1e-4), (loss3, ref3)

    print("KERNEL_OK")
</pallas_src>

<mosaic_0001>
module attributes {stable_mosaic.version = 11 : i64} {
  func.func @_ultra_loss_kernel(%arg0: i32, %arg1: memref<8x32xf32, #tpu.memory_space<vmem>>, %arg2: memref<8x1xi32, #tpu.memory_space<vmem>>, %arg3: memref<1x8x128xf32, #tpu.memory_space<vmem>>) attributes {dimension_semantics = [#tpu.dimension_semantics<parallel>], iteration_bounds = array<i64: 1>, scalar_prefetch = 0 : i64, scratch_operands = 0 : i64, tpu.core_type = #tpu.core_type<tc>, window_params = [{transform_indices = @transform_0, window_bounds = array<i64: 8, 32>}, {transform_indices = @transform_1, window_bounds = array<i64: 8, 1>}, {transform_indices = @transform_2, window_bounds = array<i64: 1, 8, 128>}]} {
    %c0 = arith.constant 0 : index
    %c0_0 = arith.constant 0 : index
    %0 = vector.load %arg1[%c0, %c0_0] : memref<8x32xf32, #tpu.memory_space<vmem>>, vector<8x32xf32>
    %cst = arith.constant dense<0xFF800000> : vector<8xf32>
    %1 = vector.multi_reduction <maximumf>, %0, %cst [1] : vector<8x32xf32> to vector<8xf32>
    %2 = vector.shape_cast %1 : vector<8xf32> to vector<8x1xf32>
    %3 = vector.broadcast %2 : vector<8x1xf32> to vector<8x32xf32>
    %4 = arith.subf %0, %3 : vector<8x32xf32>
    %5 = math.exp %4 : vector<8x32xf32>
    %cst_1 = arith.constant dense<0.000000e+00> : vector<8xf32>
    %6 = vector.multi_reduction <add>, %5, %cst_1 [1] : vector<8x32xf32> to vector<8xf32>
    %7 = vector.shape_cast %6 : vector<8xf32> to vector<8x1xf32>
    %8 = math.log %7 : vector<8x1xf32>
    %cst_2 = arith.constant dense<0.000000e+00> : vector<8xf32>
    %9 = vector.multi_reduction <add>, %4, %cst_2 [1] : vector<8x32xf32> to vector<8xf32>
    %10 = vector.shape_cast %9 : vector<8xf32> to vector<8x1xf32>
    %c0_3 = arith.constant 0 : index
    %c0_4 = arith.constant 0 : index
    %11 = vector.load %arg2[%c0_3, %c0_4] : memref<8x1xi32, #tpu.memory_space<vmem>>, vector<8x1xi32>
    %12 = tpu.iota {dimensions = array<i32: 1>} : vector<8x32xi32>
    %13 = vector.broadcast %11 : vector<8x1xi32> to vector<8x32xi32>
    %14 = arith.cmpi eq, %12, %13 : vector<8x32xi32>
    %cst_5 = arith.constant 0.000000e+00 : f32
    %15 = vector.broadcast %cst_5 : f32 to vector<8x32xf32>
    %16 = arith.select %14, %4, %15 : vector<8x32xi1>, vector<8x32xf32>
    %cst_6 = arith.constant dense<0.000000e+00> : vector<8xf32>
    %17 = vector.multi_reduction <add>, %16, %cst_6 [1] : vector<8x32xf32> to vector<8xf32>
    %18 = vector.shape_cast %17 : vector<8xf32> to vector<8x1xf32>
    %19 = arith.subf %8, %18 : vector<8x1xf32>
    %cst_7 = arith.constant 0.000000e+00 : f32
    %20 = vector.broadcast %cst_7 : f32 to vector<8x1xf32>
    %21 = arith.subf %20, %19 : vector<8x1xf32>
    %22 = math.exp %21 : vector<8x1xf32>
    %cst_8 = arith.constant 1.000000e+00 : f32
    %23 = vector.broadcast %cst_8 : f32 to vector<8x1xf32>
    %24 = arith.subf %23, %22 : vector<8x1xf32>
    %cst_9 = arith.constant 0.000000e+00 : f32
    %25 = vector.broadcast %cst_9 : f32 to vector<8x1xf32>
    %26 = arith.maximumf %24, %25 : vector<8x1xf32>
    %cst_10 = arith.constant 1.000000e+00 : f32
    %27 = vector.broadcast %cst_10 : f32 to vector<8x1xf32>
    %28 = arith.mulf %27, %26 : vector<8x1xf32>
    %29 = arith.mulf %28, %26 : vector<8x1xf32>
    %30 = arith.mulf %29, %19 : vector<8x1xf32>
    %cst_11 = arith.constant 0.949999988 : f32
    %31 = vector.broadcast %cst_11 : f32 to vector<8x1xf32>
    %32 = arith.mulf %31, %19 : vector<8x1xf32>
    %cst_12 = arith.constant 5.000000e-02 : f32
    %33 = vector.broadcast %cst_12 : f32 to vector<8x1xf32>
    %34 = arith.mulf %33, %8 : vector<8x1xf32>
    %35 = arith.addf %32, %34 : vector<8x1xf32>
    %cst_13 = arith.constant 1.562500e-03 : f32
    %36 = vector.broadcast %cst_13 : f32 to vector<8x1xf32>
    %37 = arith.mulf %36, %10 : vector<8x1xf32>
    %38 = arith.subf %35, %37 : vector<8x1xf32>
    %cst_14 = arith.constant 0.699999988 : f32
    %39 = vector.broadcast %cst_14 : f32 to vector<8x1xf32>
    %40 = arith.mulf %39, %30 : vector<8x1xf32>
    %cst_15 = arith.constant 3.000000e-01 : f32
    %41 = vector.broadcast %cst_15 : f32 to vector<8x1xf32>
    %42 = arith.mulf %41, %38 : vector<8x1xf32>
    %43 = arith.addf %40, %42 : vector<8x1xf32>
    %44 = vector.shape_cast %43 : vector<8x1xf32> to vector<1x8x1xf32>
    %cst_16 = arith.constant dense<0.000000e+00> : vector<1xf32>
    %45 = vector.multi_reduction <add>, %44, %cst_16 [1, 2] : vector<1x8x1xf32> to vector<1xf32>
    %46 = vector.shape_cast %45 : vector<1xf32> to vector<1x1x1xf32>
    %47 = vector.extract %46[0, 0, 0] : f32 from vector<1x1x1xf32>
    %48 = vector.broadcast %47 : f32 to vector<1x8x128xf32>
    %c0_17 = arith.constant 0 : index
    %c0_18 = arith.constant 0 : index
    %c0_19 = arith.constant 0 : index
    %49 = vector.load %arg3[%c0_17, %c0_18, %c0_19] : memref<1x8x128xf32, #tpu.memory_space<vmem>>, vector<1x8x128xf32>
    tpu.vector_store %arg3[%c0_17, %c0_18, %c0_19], %48 {strides = array<i32>} : memref<1x8x128xf32, #tpu.memory_space<vmem>>, vector<1x8x128xf32>,
    return
  }
  func.func @transform_0(%arg0: i32) -> (i32, i32) {
    %c0_i32 = arith.constant 0 : i32
    %c0_i32_0 = arith.constant 0 : i32
    return %arg0, %c0_i32 : i32, i32
  }
  func.func @transform_1(%arg0: i32) -> (i32, i32) {
    %c0_i32 = arith.constant 0 : i32
    %c0_i32_0 = arith.constant 0 : i32
    return %arg0, %c0_i32 : i32, i32
  }
  func.func @transform_2(%arg0: i32) -> (i32, i32, i32) {
    %c0_i32 = arith.constant 0 : i32
    %c0_i32_0 = arith.constant 0 : i32
    %c0_i32_1 = arith.constant 0 : i32
    return %arg0, %c0_i32, %c0_i32_0 : i32, i32, i32
  }
}

</mosaic_0001>

<bundles_post_ra>
// kernel: tpu_custom_call.1
= control target key start
LH: loop header
LB: loop body
LE: loop exit
PB: predicated region body
PF: predicated region fallthrough
CT: control target
= control target key end

     0   :  { %vm13_vm0 = vcmask 261120   ;;  %s156_s0 = inlined_call_operand.vmem [shape: f32[8,32], index: 0, kind: input, shape index: {}]   ;;  %s157_s1 = inlined_call_operand.vmem [shape: s32[8,1], index: 1, kind: input, shape index: {}]   ;;  %s158_s2 = inlined_call_operand.hbm [shape: f32[1,8,128], index: 2, kind: output, shape index: {}]  }
   0x1   :  { %v12_v0 = vld [vmem:[%s156_s0] sm:$0xff] }
   0x2   :  { %7 = vsyncpa [#allocation3], 0  ;;  %v14_v1 = vsel %vm13_vm0, %v12_v0, -inf  ;;  %v117_v2 = vmov 0   ;;  %v28_v3 = vld [vmem:[%s157_s1] sm:$0xff]  ;;  %v29_v7 = vlaneseq  ;;  %vm55_vm2 = vcmask 7168  }
   0x3   :  { %86 = vset.pattern.permute.xlu0 %v117_v2  ;;  %s118_s0 = smov [#allocation2]  }
   0x4   :  { %15 = vmax.xlane.f32.xlu0 %v14_v1  ;;  %v30_v8 = vand.u32 127, %v29_v7  ;;  %s74_s1 = sshll.u32 %s118_s0, 4  ;;  %s75_s1 = int_to_ptr.vmem [resolvable:$true] %s74_s1 }
   0x5   :  { %s93_s14 = scalar_lea.vmem %s75_s1, 128  ;;  %p98_p1 = scmp.lt.s32.totalorder %s75_s1, %s75_s1 }
   0x6   :  { %p94_p0 = scmp.ne.s32.totalorder %s75_s1, %s93_s14  ;;  %p99_p2 = scmp.lt.s32.totalorder %s93_s14, %s93_s14 }
   0x8   :  { %p100_p3 = por %p99_p2, %p98_p1 }
   0xa   :  { %p101_p4 = pnand %p100_p3, %p94_p0 }
  0x1a   :  { %32 = vperm.xlu0 %86, %v28_v3  }
  0x91   :  { %v16_v4 = vpop.xlane.xlu0 %15 }
  0x92   :  { %v17_v5 = vsub.f32 %v12_v0, %v16_v4 }
  0x94   :  { %v18_v6 = vmul.f32 1.442695, %v17_v5  ;;  %v25_v14 = vsel %vm13_vm0, %v17_v5, 0.0 }
  0x96   :  { %87 = vpow2.f32 %v18_v6 }
  0x99   :  { %v33_v9 = vpop.permute.xlu0 %32 }
  0x9a   :  { %vm34_vm1 = vcmp.eq.s32.totalorder %v30_v8, %v33_v9 }
  0x9b   :  { %v35_v12 = vsel %vm34_vm1, %v17_v5, 0.0 }
  0x9c   :  { %v36_v13 = vsel %vm13_vm0, %v35_v12, 0.0 }
  0xa0   :  { %v88_v10 = vpop.eup %87 }
  0xa1   :  { %v20_v11 = vsel %vm13_vm0, %v88_v10, 0.0 }
  0xa2   :  { %21 = vadd.xlane.f32.xlu1 %v20_v11 }
  0xa6   :  { %37 = vadd.xlane.f32.xlu1 %v36_v13 }
  0xaa   :  { %26 = vadd.xlane.f32.xlu1 %v25_v14 }
 0x12f   :  { %v22_v15 = vpop.xlane.xlu1 %21 }
 0x130   :  { %89 = vlog2.f32 %v22_v15 }
 0x133   :  { %v38_v18 = vpop.xlane.xlu1 %37 }
 0x137   :  { %v27_v25 = vpop.xlane.xlu1 %26 }
 0x138   :  { %v50_v28 = vmul.f32 0.0015625, %v27_v25 }
 0x13a   :  { %v90_v16 = vpop.eup %89 }
 0x13b   :  { %v24_v17 = vmul.f32 0.6931472, %v90_v16 }
 0x13d   :  { %v39_v19 = vsub.f32 %v24_v17, %v38_v18  ;;  %v48_v23 = vmul.f32 0.05, %v24_v17 }
 0x13f   :  { %v40_v20 = vsub.f32 0.0, %v39_v19  ;;  %v47_v22 = vmul.f32 0.95, %v39_v19 }
 0x141   :  { %v41_v21 = vmul.f32 1.442695, %v40_v20  ;;  %v49_v26 = vadd.f32 %v48_v23, %v47_v22 }
 0x143   :  { %91 = vpow2.f32 %v41_v21  ;;  %v51_v30 = vsub.f32 %v49_v26, %v50_v28 }
 0x145   :  { %v53_v33 = vmul.f32 0.3, %v51_v30 }
 0x14d   :  { %v92_v24 = vpop.eup %91 }
 0x14e   :  { %v43_v27 = vsub.f32 1.0, %v92_v24 }
 0x150   :  { %v44_v29 = vmax.f32 %v43_v27, 0.0 }
 0x152   :  { %v45_v31 = vmul.f32 %v44_v29, %v44_v29 }
 0x154   :  { %v46_v32 = vmul.f32 %v45_v31, %v39_v19 }
 0x156   :  { %v52_v34 = vmul.f32 0.7, %v46_v32 }
 0x158   :  { %v54_v35 = vadd.f32 %v53_v33, %v52_v34 }
 0x15a   :  { %v56_v36 = vsel %vm55_vm2, %v54_v35, 0.0 }
 0x15b   :  { %57 = vadd.xlane.f32.xlu1 %v56_v36 }
 0x1e8   :  { %v58_v37 = vpop.xlane.xlu1 %57 }
 0x1e9   :  { %v59_v38 = vrot.slane %v58_v37, 4 }
 0x1eb   :  { %v60_v39 = vadd.f32 %v59_v38, %v58_v37 }
 0x1ed   :  { %v61_v40 = vrot.slane %v60_v39, 2 }
 0x1ef   :  { %v62_v41 = vadd.f32 %v61_v40, %v60_v39 }
 0x1f1   :  { %v63_v42 = vrot.slane %v62_v41, 1 }
 0x1f3   :  { %v64_v43 = vadd.f32 %v63_v42, %v62_v41 }
 0x1f5   :  { %82 = vpush %v64_v43 }
 0x226   :  { %s83_s13 = spop %82 }
 0x227   :  { %v66_v44 = vstv %s83_s13 }
 0x228   :  { %67 = vst [vmem:[#allocation2] sm:$0xff] %v66_v44 }
 0x229   :  { %104 = shalt.err (!%p101_p4)
}
 0x22a   :  { %s105_s17 = scalar_lea.hbm %s158_s2, 128 }
 0x22b   :  { %p106_p5 = scmp.ne.s32.totalorder %s158_s2, %s105_s17  ;;  %p109_p6 = scmp.lt.u32.totalorder %s105_s17, %s158_s2 }
 0x22d   :  { %p111_p7 = pnand %p109_p6, %p106_p5 }
 0x22f   :  { %114 = shalt.err (!%p111_p7)
}
 0x230   :  { %77 = dma.vmem_to_hbm [thread:$0]  %s75_s1, 128, %s158_s2, [#allocation3]  }
 0x231   :  { %115 = dma.done.wait [#allocation3], 128  }
 0x232   :  { %116 = vsyncadd [#allocation3], 4294967168 }
 0x233   :  { %81 = vsyncpa [#allocation3], 1 }

</bundles_post_ra>
